<compile_context>
chip_gen: v7x
topology: tpu7x:2x2x1
jax: 0.10.0
libtpu: 0.0.40
codegen_flags: <defaults>
</compile_context>

<pallas_src>
import functools

import jax
import jax.numpy as jnp
from jax import lax
from jax.experimental import pallas as pl
from jax.experimental.pallas import tpu as pltpu


def _round_up(x, m):
    return ((x + m - 1) // m) * m


def _cdiv(a, b):
    return (a + b - 1) // b


def _bp_kernel(x_ref, w_ref, o_ref, acc_ref, *,
               c_out_pad, hw, hw_t, chunk, tiles_per_split, needs_mask, inv_hw):
    # Grid = (split, batch, hw_tile); trailing hw axis is the reduction.
    # x_ref:   (C_in, hw_t)           lane-dense pixel tile
    # w_ref:   (2*C_out_pad, C_in)    fused [W0; W1] weights (grid-resident)
    # o_ref:   (C_out_pad, 1)         partial pooled output (written on last hw step)
    # acc_ref: (C_out_pad, chunk)     f32 running partial sums (VMEM scratch)
    h = pl.program_id(2)
    n_chunks = hw_t // chunk

    @pl.when(h == 0)
    def _init():
        acc_ref[...] = jnp.zeros_like(acc_ref)

    w = w_ref[...]                                        # (2*C_out_pad, C_in)
    col0 = 0
    if needs_mask:
        col0 = (pl.program_id(0) * tiles_per_split + h) * hw_t

    def contrib(i, start):
        # One fused MXU matmul for both 1x1 convolutions; f32 accumulation.
        xc = x_ref[:, pl.ds(start, chunk)]                # (C_in, chunk)
        f = jnp.dot(w, xc, preferred_element_type=jnp.float32)
        p = f[:c_out_pad, :] * f[c_out_pad:, :]           # bilinear features (f32)
        if needs_mask:
            # Boundary tiles over-cover HW; zero the out-of-range lanes
            # (their DMA'd contents are unspecified).  Pure VPU work.
            col = col0 + start + lax.broadcasted_iota(jnp.int32, p.shape, 1)
            p = jnp.where(col < hw, p, 0.0)
        return p
        del i  # (loop index only used via `start`)

    # Chunked accumulation keeps f / p / the partial sum in vregs.
    if n_chunks == 1:
        part = contrib(0, 0)
    else:
        part = lax.fori_loop(
            1, n_chunks,
            lambda i, a: a + contrib(i, pl.multiple_of(i * chunk, chunk)),
            contrib(0, 0))

    acc_ref[...] += part                                  # pure VPU adds

    @pl.when(h == pl.num_programs(2) - 1)
    def _finalize():
        # Single cross-lane (XLU) reduce per (split, batch) block.
        pooled = jnp.sum(acc_ref[...], axis=-1, keepdims=True) * inv_hw
        # TODO(synk): for C_out >= 128 switch to a lane-dense (1, C_out) output
        # block to avoid the 1-lane masked store (negligible at small C_out).
        o_ref[...] = pooled.astype(o_ref.dtype)


def _vmem_budget():
    """Generation-aware planning budget + explicit scoped-VMEM limit."""
    try:
        cap = int(pltpu.get_tpu_info().vmem_capacity_bytes)
    except Exception:
        cap = 0
    if cap <= 0:
        cap = 64 << 20            # conservative fallback = v7x per-core VMEM
    tile_budget = min(cap // 2, 48 << 20)        # working-set target for tiling
    vmem_limit = int(min(cap * 0.85, tile_budget + (16 << 20)))
    return tile_budget, vmem_limit


def _plan_tiles(batch, c_in, c_out_pad, hw, itemsize, tile_budget, w_bytes,
                target_x_bytes=2 << 20):
    """Choose (n_splits, tiles_per_split, hw_t).

    hw_t is a multiple of 128 (or the full HW extent when a single tile fits),
    sized so the double-buffered x tile fits the VMEM budget while targeting
    ~target_x_bytes of x per grid step (amortizes ~0.35us/step overhead and
    keeps the DMA pipeline at the HBM roofline).
    """
    hw128 = _round_up(max(hw, 1), 128)
    budget = max(tile_budget - 2 * w_bytes - (1 << 20), 1 << 20)
    cap_budget = max(128, (budget // (2 * c_in * itemsize)) // 128 * 128)
    cap_target = max(128, (target_x_bytes // max(1, c_in * itemsize)) // 128 * 128)
    hw_t_cap = min(cap_budget, cap_target)

    # Split the HW reduction into 2 parallel partial sums when the batch axis
    # alone would leave one v7x TensorCore idle (odd or unit batch).
    n_splits = 2 if (batch % 2 == 1 and hw128 >= 256) else 1

    if n_splits == 1 and hw128 <= hw_t_cap:
        return 1, 1, hw                      # single full-extent tile, no mask

    n_tiles = n_splits * max(1, _cdiv(hw128, n_splits * hw_t_cap))
    hw_t = min(_round_up(_cdiv(hw, n_tiles), 128), hw128)
    # Keep every tile's start strictly in-bounds (boundary DMAs are partial,
    # never fully out of range); shrinking the tile count only grows hw_t.
    while n_tiles > n_splits and (n_tiles - 1) * hw_t >= hw:
        n_tiles -= n_splits
        hw_t = min(_round_up(_cdiv(hw, n_tiles), 128), hw128)
    if hw_t >= hw:
        return 1, 1, hw                      # degenerate tiny-HW case
    return n_splits, n_tiles // n_splits, hw_t


def _pick_chunk(hw_t):
    """Largest of 512/256/128 dividing hw_t (vreg-resident inner chunk)."""
    for c in (512, 256, 128):
        if hw_t % c == 0:
            return c
    return hw_t


def bp_layer(x_nchw, w0, w1):
    """Forward of BPLayer: (B, C_in, H, W) -> (B, C_out)."""
    B, C_in, H, W = x_nchw.shape
    C_out = w0.shape[0]
    HW = H * W

    # bf16 stays bf16 (mem-bound kernel -> half the HBM bytes); else f32.
    compute_dtype = jnp.bfloat16 if x_nchw.dtype == jnp.bfloat16 else jnp.float32
    itemsize = jnp.dtype(compute_dtype).itemsize

    # Free reshape (no transpose, no pad): HW lands on the lane axis.
    x = x_nchw.reshape(B, C_in, HW).astype(compute_dtype)

    # Sublane-aligned fused weights: pad W0/W1 to a multiple of 8 rows so the
    # in-kernel f[:C]/f[C:] split lands on a vreg tile boundary.
    C_out_pad = _round_up(C_out, 8)
    w0m = w0.reshape(C_out, C_in)
    w1m = w1.reshape(C_out, C_in)
    if C_out_pad != C_out:
        pad = ((0, C_out_pad - C_out), (0, 0))
        w0m, w1m = jnp.pad(w0m, pad), jnp.pad(w1m, pad)
    w_cat = jnp.concatenate([w0m, w1m], axis=0).astype(compute_dtype)
    w_bytes = 2 * C_out_pad * C_in * itemsize

    tile_budget, vmem_limit = _vmem_budget()
    n_splits, tiles_per_split, hw_t = _plan_tiles(
        B, C_in, C_out_pad, HW, itemsize, tile_budget, w_bytes)
    chunk = _pick_chunk(hw_t)
    needs_mask = n_splits * tiles_per_split * hw_t != HW

    grid = (n_splits, B, tiles_per_split)

    kernel = functools.partial(
        _bp_kernel, c_out_pad=C_out_pad, hw=HW, hw_t=hw_t, chunk=chunk,
        tiles_per_split=tiles_per_split, needs_mask=needs_mask, inv_hw=1.0 / HW)

    cost = pl.CostEstimate(
        flops=int(2 * (2 * C_out_pad) * C_in * HW * B + 2 * C_out_pad * HW * B),
        transcendentals=0,
        bytes_accessed=int(B * C_in * HW * itemsize + w_bytes
                           + n_splits * B * C_out_pad * 4),
    )

    out = pl.pallas_call(
        kernel,
        out_shape=jax.ShapeDtypeStruct((n_splits, B, C_out_pad, 1), jnp.float32),
        grid=grid,
        in_specs=[
            pl.BlockSpec((None, C_in, hw_t),
                         lambda s, b, h: (b, 0, s * tiles_per_split + h)),
            pl.BlockSpec((2 * C_out_pad, C_in), lambda s, b, h: (0, 0)),
        ],
        # NOTE: the output block index ignores the trailing hw axis on purpose
        # (accumulate pattern); hw must stay the trailing "arbitrary" axis.
        out_specs=pl.BlockSpec((None, None, C_out_pad, 1),
                               lambda s, b, h: (s, b, 0, 0)),
        scratch_shapes=[pltpu.VMEM((C_out_pad, chunk), jnp.float32)],
        compiler_params=pltpu.CompilerParams(
            dimension_semantics=("parallel", "parallel", "arbitrary"),
            vmem_limit_bytes=vmem_limit),
        cost_estimate=cost,
    )(x, w_cat)

    # Combine the (at most 2) partial sums and drop the padded output channels.
    return jnp.sum(out, axis=0)[:, :C_out, 0]


def _reference(x_nchw, w0, w1):
    # Pure-JAX reference mirroring the PyTorch forward (f32 math).
    B, C_in, H, W = x_nchw.shape
    C_out = w0.shape[0]
    xf = x_nchw.astype(jnp.float32).reshape(B, C_in, H * W)
    f0 = jnp.einsum("oc,bcl->bol", w0.reshape(C_out, C_in).astype(jnp.float32), xf)
    f1 = jnp.einsum("oc,bcl->bol", w1.reshape(C_out, C_in).astype(jnp.float32), xf)
    return jnp.mean(f0 * f1, axis=-1)


def _make_inputs(key, B, C_in, C_out, H, W):
    kx, k0, k1 = jax.random.split(key, 3)
    x = jax.random.normal(kx, (B, C_in, H, W), dtype=jnp.float32)
    std = (2.0 / C_in) ** 0.5   # kaiming_normal_ (fan_in, a=0, 1x1 kernel)
    w0 = std * jax.random.normal(k0, (C_out, C_in, 1, 1), dtype=jnp.float32)
    w1 = std * jax.random.normal(k1, (C_out, C_in, 1, 1), dtype=jnp.float32)
    return x, w0, w1


if __name__ == "__main__":
    key = jax.random.PRNGKey(0)
    k_a, k_b = jax.random.split(key, 2)

    # Canonical small shape: batch=2, in_dim=4, out_dim=8, 16x16 spatial.
    x, w0, w1 = _make_inputs(k_a, 2, 4, 8, 16, 16)
    out = jax.block_until_ready(bp_layer(x, w0, w1))
    ref = _reference(x, w0, w1)
    assert out.shape == (2, 8)
    assert jnp.allclose(out, ref, rtol=1e-5, atol=1e-5), float(
        jnp.max(jnp.abs(out - ref)))

    # Odd batch + non-128-multiple spatial: exercises the 2-way HW split
    # (v7x megacore) and the in-kernel boundary mask.
    x2, w0b, w1b = _make_inputs(k_b, 1, 4, 8, 23, 23)
    out2 = jax.block_until_ready(bp_layer(x2, w0b, w1b))
    ref2 = _reference(x2, w0b, w1b)
    assert out2.shape == (1, 8)
    assert jnp.allclose(out2, ref2, rtol=1e-5, atol=1e-5), float(
        jnp.max(jnp.abs(out2 - ref2)))

    # bf16 fast path (inputs stay bf16 end-to-end; f32 accumulation on MXU).
    xb = x.astype(jnp.bfloat16)
    out3 = jax.block_until_ready(bp_layer(xb, w0, w1))
    ref3 = _reference(xb.astype(jnp.float32), w0, w1)
    assert out3.shape == (2, 8)
    assert jnp.allclose(out3, ref3, rtol=5e-2, atol=5e-2), float(
        jnp.max(jnp.abs(out3 - ref3)))

    print("KERNEL_OK")
</pallas_src>

<mosaic_0001>
module attributes {stable_mosaic.version = 11 : i64} {
  func.func @_bp_kernel(%arg0: i32, %arg1: i32, %arg2: i32, %arg3: memref<1x4x256xf32, #tpu.memory_space<vmem>>, %arg4: memref<16x4xf32, #tpu.memory_space<vmem>>, %arg5: memref<1x1x8x1xf32, #tpu.memory_space<vmem>>, %arg6: memref<8x256xf32, #tpu.memory_space<vmem>>) attributes {dimension_semantics = [#tpu.dimension_semantics<parallel>, #tpu.dimension_semantics<parallel>, #tpu.dimension_semantics<arbitrary>], iteration_bounds = array<i64: 1, 2, 1>, scalar_prefetch = 0 : i64, scratch_operands = 1 : i64, tpu.core_type = #tpu.core_type<tc>, window_params = [{transform_indices = @transform_0, window_bounds = array<i64: 1, 4, 256>}, {pipeline_mode = #tpu.pipeline_mode<synchronous>, transform_indices = @transform_1, window_bounds = array<i64: 16, 4>}, {transform_indices = @transform_2, window_bounds = array<i64: 1, 1, 8, 1>}]} {
    %c0_i32 = arith.constant 0 : i32
    %0 = arith.cmpi eq, %arg2, %c0_i32 : i32
    %1 = arith.extui %0 : i1 to i32
    %c0_i32_0 = arith.constant 0 : i32
    %2 = arith.cmpi ne, %1, %c0_i32_0 : i32
    scf.if %2 {
      %cst_11 = arith.constant 0.000000e+00 : f32
      %16 = vector.broadcast %cst_11 : f32 to vector<8x256xf32>
      %c0_12 = arith.constant 0 : index
      %c0_13 = arith.constant 0 : index
      %17 = vector.load %arg6[%c0_12, %c0_13] : memref<8x256xf32, #tpu.memory_space<vmem>>, vector<8x256xf32>
      tpu.vector_store %arg6[%c0_12, %c0_13], %16 {strides = array<i32>} : memref<8x256xf32, #tpu.memory_space<vmem>>, vector<8x256xf32>,
    } else {
    }
    %c0 = arith.constant 0 : index
    %c0_1 = arith.constant 0 : index
    %3 = vector.load %arg4[%c0, %c0_1] : memref<16x4xf32, #tpu.memory_space<vmem>>, vector<16x4xf32>
    %c0_2 = arith.constant 0 : index
    %c0_3 = arith.constant 0 : index
    %c0_4 = arith.constant 0 : index
    %4 = vector.load %arg3[%c0_2, %c0_3, %c0_4] : memref<1x4x256xf32, #tpu.memory_space<vmem>>, vector<1x4x256xf32>
    %5 = vector.shape_cast %4 : vector<1x4x256xf32> to vector<4x256xf32>
    %cst = arith.constant dense<0.000000e+00> : vector<16x256xf32>
    %6 = tpu.matmul %3, %5, %cst {dimension_numbers = #tpu.dot_dimension_numbers<[1], [0], [0], [1], [0, 0, 1, 1], [], []>} : vector<16x4xf32>, vector<4x256xf32>, vector<16x256xf32> -> vector<16x256xf32>
    %7 = vector.extract_strided_slice %6 {offsets = [0, 0], sizes = [8, 256], strides = [1, 1]} : vector<16x256xf32> to vector<8x256xf32>
    %8 = vector.extract_strided_slice %6 {offsets = [8, 0], sizes = [8, 256], strides = [1, 1]} : vector<16x256xf32> to vector<8x256xf32>
    %9 = arith.mulf %7, %8 : vector<8x256xf32>
    %c0_5 = arith.constant 0 : index
    %c0_6 = arith.constant 0 : index
    %10 = vector.load %arg6[%c0_5, %c0_6] : memref<8x256xf32, #tpu.memory_space<vmem>>, vector<8x256xf32>
    %11 = arith.addf %10, %9 : vector<8x256xf32>
    %c0_7 = arith.constant 0 : index
    %c0_8 = arith.constant 0 : index
    %12 = vector.load %arg6[%c0_7, %c0_8] : memref<8x256xf32, #tpu.memory_space<vmem>>, vector<8x256xf32>
    tpu.vector_store %arg6[%c0_7, %c0_8], %11 {strides = array<i32>} : memref<8x256xf32, #tpu.memory_space<vmem>>, vector<8x256xf32>,
    %c0_i32_9 = arith.constant 0 : i32
    %13 = arith.cmpi eq, %arg2, %c0_i32_9 : i32
    %14 = arith.extui %13 : i1 to i32
    %c0_i32_10 = arith.constant 0 : i32
    %15 = arith.cmpi ne, %14, %c0_i32_10 : i32
    scf.if %15 {
      %c0_11 = arith.constant 0 : index
      %c0_12 = arith.constant 0 : index
      %16 = vector.load %arg6[%c0_11, %c0_12] : memref<8x256xf32, #tpu.memory_space<vmem>>, vector<8x256xf32>
      %cst_13 = arith.constant dense<0.000000e+00> : vector<8xf32>
      %17 = vector.multi_reduction <add>, %16, %cst_13 [1] : vector<8x256xf32> to vector<8xf32>
      %18 = vector.shape_cast %17 : vector<8xf32> to vector<8x1xf32>
      %cst_14 = arith.constant 3.906250e-03 : f32
      %19 = vector.broadcast %cst_14 : f32 to vector<8x1xf32>
      %20 = arith.mulf %18, %19 : vector<8x1xf32>
      %c0_15 = arith.constant 0 : index
      %c0_16 = arith.constant 0 : index
      %c0_17 = arith.constant 0 : index
      %c0_18 = arith.constant 0 : index
      %21 = vector.load %arg5[%c0_15, %c0_16, %c0_17, %c0_18] : memref<1x1x8x1xf32, #tpu.memory_space<vmem>>, vector<1x1x8x1xf32>
      %22 = vector.shape_cast %21 : vector<1x1x8x1xf32> to vector<8x1xf32>
      %23 = vector.shape_cast %20 : vector<8x1xf32> to vector<1x1x8x1xf32>
      tpu.vector_store %arg5[%c0_15, %c0_16, %c0_17, %c0_18], %23 {strides = array<i32>} : memref<1x1x8x1xf32, #tpu.memory_space<vmem>>, vector<1x1x8x1xf32>,
    } else {
    }
    return
  }
  func.func @transform_0(%arg0: i32, %arg1: i32, %arg2: i32) -> (i32, i32, i32) {
    %c1_i32 = arith.constant 1 : i32
    %0 = arith.muli %arg0, %c1_i32 : i32
    %1 = arith.addi %0, %arg2 : i32
    %c0_i32 = arith.constant 0 : i32
    %c0_i32_0 = arith.constant 0 : i32
    return %arg1, %c0_i32, %1 : i32, i32, i32
  }
  func.func @transform_1(%arg0: i32, %arg1: i32, %arg2: i32) -> (i32, i32) {
    %c0_i32 = arith.constant 0 : i32
    %c0_i32_0 = arith.constant 0 : i32
    %c0_i32_1 = arith.constant 0 : i32
    return %c0_i32, %c0_i32_0 : i32, i32
  }
  func.func @transform_2(%arg0: i32, %arg1: i32, %arg2: i32) -> (i32, i32, i32, i32) {
    %c0_i32 = arith.constant 0 : i32
    %c0_i32_0 = arith.constant 0 : i32
    %c0_i32_1 = arith.constant 0 : i32
    return %arg0, %arg1, %c0_i32, %c0_i32_0 : i32, i32, i32, i32
  }
}

</mosaic_0001>

<bundles_post_ra>
// kernel: tpu_custom_call.1
= control target key start
LH: loop header
LB: loop body
LE: loop exit
PB: predicated region body
PF: predicated region fallthrough
CT: control target
= control target key end

     0   :  { %s482_s9 = smov 0   ;;  %s484_s10 = smov 0   ;;  %s521_s0 = inlined_call_operand.vmem [shape: f32[2,4,256], index: 0, kind: input, shape index: {}]   ;;  %s522_s1 = inlined_call_operand.vmem [shape: f32[16,4], index: 1, kind: input, shape index: {}]   ;;  %s523_s2 = inlined_call_operand.vmem [shape: f32[1,2,8,1], index: 2, kind: output, shape index: {}]  }
   0x1   :  { %s486_s11 = smov 0  }
   0x2 LB: > { %s27_s12 = sadd.s32 1, %s460_s10  ;;  %p403_p0 = scmp.ge.s32.totalorder %s464_s11, 1  ;;  %s464_s11 = sphi %s486_s11, %s12_s11   ;;  %s460_s10 = sphi %s484_s10, %s525_s10   ;;  %s456_s9 = sphi %s482_s9, %s524_s9  }
   0x3   : > { %p29_p1 = scmp.ge.s32.totalorder %s27_s12, 2  ;;  %p144_p2 = scmp.lt.s32.totalorder %s464_s11, 3 }
   0x5   : > { %s527_s12 = smov (%p29_p1, %s27_s12), 0  ;;  %p145_p3 = pnand %p403_p0, %p144_p2 }
   0x6   : > { %p176_p4 = scmp.lt.s32.totalorder (!%p145_p3), %s456_s9, 1  ;;  %v466_v0 = vmov (!%p145_p3), 0.0   ;;  %vm212_vm0 = vcmask (!%p145_p3), 1043456   ;;  %v200_v3 = vld [vmem:[%s522_s1] sm:$0xff] (!%p145_p3)  ;;  %vm205_vm1 = vcmask (!%p145_p3), 31744   ;;  %v201_v4 = vld [vmem:[%s522_s1 + $0x8] sm:$0xff] (!%p145_p3) }
   0x7   : > { %148 = sbr.rel (%p145_p3) target bundleno = 384 (0x180), region = 28  ;;  %281 = vmatprep.mubr.f32.mxu0 (!%p145_p3), %v466_v0  ;;  %287 = vmatprep.mubr.f32.mxu1 (!%p145_p3), %v466_v0  ;;  %vm311_vm2 = vcmask (!%p145_p3), 7168  }
   0xe   : > { %s529_s9 = smov (!%p176_p4, %s456_s9), 1 }
   0xf   : > { %s413_s13 = sshll.u32 %s529_s9, 3 }
  0x10   : > { %s183_s16 = scalar_lea.vmem %s521_s0, %s413_s13  ;;  %s193_s23 = scalar_lea.vmem %s523_s2, %s413_s13 }
  0x11   : > { %v202_v1 = vld [vmem:[%s183_s16] sm:$0xff] }
  0x12   : > { %v204_v2 = vcombine.high %v202_v1, %v202_v1 }
  0x14   : > { %407 = vmatprep.subr.msk.mxu0 %vm212_vm0, %v204_v2  ;;  %414 = vmatprep.subr.msk.mxu1 %vm212_vm0, %v204_v2 }
  0x15   : > { %408 = vmatpush1.msk.msra.mxu0 %vm212_vm0, %v202_v1  ;;  %415 = vmatpush1.msk.msra.mxu1 %vm212_vm0, %v202_v1 }
  0x16   : > { %409 = vmatmul.mubr.msk.f32.vlgmr.msra.gmra.mrb[0].mxu0 %vm205_vm1, %v200_v3  ;;  %410 = vmatmul.mubr.msk.f32.vlgmr.msra.gmra.mrb[0].mxu1 %vm205_vm1, %v201_v4 }
  0xe9   : > { %v283_v5 = vpop.f32.mrb[0].mxu0  ;;  %v289_v6 = vpop.f32.mrb[0].mxu1 }
  0xea   : > { %v294_v7 = vmul.f32 %v289_v6, %v283_v5  ;;  %v285_v8 = vpop.f32.mrb[1].mxu0  ;;  %v291_v9 = vpop.f32.mrb[1].mxu1 }
  0xeb   : > { %v295_v10 = vmul.f32 %v291_v9, %v285_v8 }
  0xed   : > { %v307_v11 = vadd.f32 %v295_v10, %v294_v7 }
  0xef   : > { %308 = vadd.xlane.f32.xlu0 %v307_v11 }
 0x17c   : > { %v309_v12 = vpop.xlane.xlu0 %308 }
 0x17d   : > { %v310_v13 = vmul.f32 0.00390625, %v309_v12 }
 0x17f   : > { %312 = vst.msk [vmem:[%s193_s23] sm:$0xff] %vm311_vm2, %v310_v13 }
 0x180 PF: > { %s12_s11 = sadd.s32 1, %s464_s11   ;;  %s524_s9 = smov %s460_s10 }
 0x181   : > { %p9_p5 = scmp.ge.s32.totalorder %s12_s11, 4   ;;  %s525_s10 = smov %s527_s12 }
 0x183   :  { %11 = sbr.rel (!%p9_p5) target bundleno = 2 (0x2), region = 66 }

</bundles_post_ra>
